<compile_context>
chip_gen: v6e
topology: v6e:2x2x1
jax: 0.10.0
libtpu: 0.0.40
codegen_flags: <defaults>
</compile_context>

<pallas_src>
import jax
import jax.numpy as jnp
from jax.experimental import pallas as pl
from jax.experimental.pallas import tpu as pltpu


# ----------------------------------------------------------------------------
# Pallas kernel: one dense matmul + bias per (tM, Cout) output tile
# ----------------------------------------------------------------------------
def _patch_embed_kernel(x_ref, w_ref, b_ref, o_ref):
    """x_ref: (tM, K)  w_ref: (K, Cout)  b_ref: (1, Cout) f32  o_ref: (tM, Cout)."""
    y = jnp.dot(x_ref[...], w_ref[...], preferred_element_type=jnp.float32)
    o_ref[...] = (y + b_ref[...]).astype(o_ref.dtype)


# ----------------------------------------------------------------------------
# Glue: patch extraction / im2col (layout plumbing only, single transpose in
# the default non-overlapping case)
# ----------------------------------------------------------------------------
def _im2col(x_nchw, ks, stride, pad):
    """NCHW -> (M, ks*ks*C) with column order (ky, kx, c). Returns (xm, N, Ho, Wo)."""
    N, C, H, W = x_nchw.shape
    if pad == 0 and ks == stride and H % ks == 0 and W % ks == 0:
        # Non-overlapping patches (module default): one fused transpose,
        # NCHW -> (N, Ho, Wo, ky, kx, C).
        Ho, Wo = H // ks, W // ks
        p = x_nchw.reshape(N, C, Ho, ks, Wo, ks)
        p = p.transpose(0, 2, 4, 3, 5, 1)
        return p.reshape(N * Ho * Wo, ks * ks * C), N, Ho, Wo

    # General overlapping / reflect-padded case: gather-based im2col.
    x = jnp.transpose(x_nchw, (0, 2, 3, 1))                       # NHWC
    if pad > 0:
        x = jnp.pad(x, ((0, 0), (pad, pad), (pad, pad), (0, 0)), mode="reflect")
    Np, Hp, Wp, Cc = x.shape
    Ho = (Hp - ks) // stride + 1
    Wo = (Wp - ks) // stride + 1
    h_idx = (jnp.arange(Ho)[:, None] * stride + jnp.arange(ks)[None, :]).reshape(-1)
    w_idx = (jnp.arange(Wo)[:, None] * stride + jnp.arange(ks)[None, :]).reshape(-1)
    p = jnp.take(x, h_idx, axis=1).reshape(Np, Ho, ks, Wp, Cc)
    p = jnp.take(p, w_idx, axis=3).reshape(Np, Ho, ks, Wo, ks, Cc)
    p = p.transpose(0, 1, 3, 2, 4, 5).reshape(Np * Ho * Wo, ks * ks * Cc)
    return p, Np, Ho, Wo


def _round_up(x, m):
    return ((x + m - 1) // m) * m


def _choose_tile_m(M):
    # Big row tiles amortize the ~0.35us/step pipeline overhead (the kernel is
    # HBM-bandwidth-bound); keep >= ~8 grid steps on large problems so the
    # "parallel" grid axis can shard across TensorCores (v7x has 2 TCs).
    tM = max(2048, _round_up(pl.cdiv(M, 8), 8))
    return min(tM, 8192, _round_up(M, 8))


# ----------------------------------------------------------------------------
# Forward wrapper (NCHW in; NCHW out by default, matching PyTorch semantics)
# ----------------------------------------------------------------------------
def down_forward(params, x_nchw, *, patch_size=4, kernel_size=None,
                 compute_dtype=jnp.bfloat16, channels_last=False):
    if kernel_size is None:
        kernel_size = patch_size
    pad = (kernel_size - patch_size + 1) // 2

    w_flat, b = params["w_flat"], params["b"]        # (K, Cout), (Cout,)
    K, Cout = w_flat.shape
    out_dtype = x_nchw.dtype

    xm, N, Ho, Wo = _im2col(x_nchw, kernel_size, patch_size, pad)
    M = xm.shape[0]

    # bf16 operands halve the activation DMA bytes; accumulate / bias-add in f32.
    xm = xm.astype(compute_dtype)
    w = w_flat.astype(compute_dtype)
    b2 = b.reshape(1, Cout).astype(jnp.float32)

    tM = _choose_tile_m(M)
    grid = (pl.cdiv(M, tM),)                         # ragged last block is masked

    dsize = jnp.dtype(compute_dtype).itemsize
    osize = jnp.dtype(out_dtype).itemsize
    cost = pl.CostEstimate(
        flops=2 * M * K * Cout,
        transcendentals=0,
        bytes_accessed=M * K * dsize + K * Cout * dsize + M * Cout * osize + Cout * 4,
    )

    out = pl.pallas_call(
        _patch_embed_kernel,
        out_shape=jax.ShapeDtypeStruct((M, Cout), out_dtype),
        grid=grid,
        in_specs=[
            pl.BlockSpec((tM, K), lambda i: (i, 0)),      # activations, tiled over M
            pl.BlockSpec((K, Cout), lambda i: (0, 0)),    # weight: resident in VMEM
            pl.BlockSpec((1, Cout), lambda i: (0, 0)),    # bias: resident in VMEM
        ],
        out_specs=pl.BlockSpec((tM, Cout), lambda i: (i, 0)),   # lane-dense store
        compiler_params=pltpu.CompilerParams(
            dimension_semantics=("parallel",),
            vmem_limit_bytes=32 * 1024 * 1024,   # guards v5e's 16 MiB scoped default
        ),
        cost_estimate=cost,
    )(xm, w, b2)

    out = out.reshape(N, Ho, Wo, Cout)
    if channels_last:
        # Skip the trailing HBM transpose when the consumer takes NHWC / (N, L, C).
        return out
    return jnp.transpose(out, (0, 3, 1, 2))          # -> NCHW (module-faithful)


# ----------------------------------------------------------------------------
# Parameter init (mirrors PyTorch Conv2d default uniform ranges)
# ----------------------------------------------------------------------------
def init_down_params(key, in_chans=3, embed_dim=96, kernel_size=4):
    kw, kb = jax.random.split(key)
    fan_in = in_chans * kernel_size * kernel_size
    bound = 1.0 / jnp.sqrt(fan_in)
    w_oihw = jax.random.uniform(
        kw, (embed_dim, in_chans, kernel_size, kernel_size), jnp.float32, -bound, bound)
    b = jax.random.uniform(kb, (embed_dim,), jnp.float32, -bound, bound)
    # (Cout,Cin,kh,kw) -> (kh,kw,Cin,Cout) -> (kh*kw*Cin, Cout): matches the
    # im2col column ordering (ky, kx, c).
    w_flat = jnp.transpose(w_oihw, (2, 3, 1, 0)).reshape(
        kernel_size * kernel_size * in_chans, embed_dim)
    return {"w_flat": w_flat, "b": b, "w_oihw": w_oihw}


# ----------------------------------------------------------------------------
# Pure-JAX reference (correctness check of the Pallas path)
# ----------------------------------------------------------------------------
def down_reference(params, x_nchw, *, patch_size=4, kernel_size=None):
    if kernel_size is None:
        kernel_size = patch_size
    pad = (kernel_size - patch_size + 1) // 2
    w_oihw, b = params["w_oihw"], params["b"]
    x = x_nchw
    if pad > 0:
        x = jnp.pad(x, ((0, 0), (0, 0), (pad, pad), (pad, pad)), mode="reflect")
    dn = jax.lax.conv_dimension_numbers(x.shape, w_oihw.shape, ("NCHW", "OIHW", "NCHW"))
    y = jax.lax.conv_general_dilated(
        x, w_oihw, window_strides=(patch_size, patch_size),
        padding="VALID", dimension_numbers=dn)
    return y + b[None, :, None, None]


# ----------------------------------------------------------------------------
if __name__ == "__main__":
    key = jax.random.PRNGKey(0)
    patch_size, in_chans, embed_dim = 4, 3, 96   # module defaults
    N, H, W = 2, 16, 16

    kp, kx = jax.random.split(key)
    params = init_down_params(kp, in_chans, embed_dim, kernel_size=patch_size)
    x = jax.random.normal(kx, (N, in_chans, H, W), jnp.float32)

    ref = jax.block_until_ready(down_reference(params, x, patch_size=patch_size))

    # Exact-math path (f32 operands): tight tolerance.
    out_f32 = jax.block_until_ready(
        down_forward(params, x, patch_size=patch_size, compute_dtype=jnp.float32))
    assert out_f32.shape == (N, embed_dim, H // patch_size, W // patch_size), out_f32.shape
    assert jnp.max(jnp.abs(out_f32 - ref)) < 2e-3, "Pallas Down (f32) mismatch vs reference"

    # Performance path (bf16 operands, f32 accumulate): looser tolerance for
    # bf16 operand rounding on O(1) outputs.
    out_bf16 = jax.block_until_ready(
        down_forward(params, x, patch_size=patch_size))   # default compute_dtype=bf16
    assert out_bf16.shape == (N, embed_dim, H // patch_size, W // patch_size), out_bf16.shape
    assert jnp.max(jnp.abs(out_bf16 - ref)) < 3e-2, "Pallas Down (bf16) mismatch vs reference"

    print("KERNEL_OK")
</pallas_src>

<mosaic_0001>
module attributes {stable_mosaic.version = 11 : i64} {
  func.func @_patch_embed_kernel(%arg0: i32, %arg1: memref<32x48xf32, #tpu.memory_space<vmem>>, %arg2: memref<48x96xf32, #tpu.memory_space<vmem>>, %arg3: memref<1x96xf32, #tpu.memory_space<vmem>>, %arg4: memref<32x96xf32, #tpu.memory_space<vmem>>) attributes {dimension_semantics = [#tpu.dimension_semantics<parallel>], iteration_bounds = array<i64: 1>, scalar_prefetch = 0 : i64, scratch_operands = 0 : i64, tpu.core_type = #tpu.core_type<tc>, window_params = [{transform_indices = @transform_0, window_bounds = array<i64: 32, 48>}, {pipeline_mode = #tpu.pipeline_mode<synchronous>, transform_indices = @transform_1, window_bounds = array<i64: 48, 96>}, {pipeline_mode = #tpu.pipeline_mode<synchronous>, transform_indices = @transform_2, window_bounds = array<i64: 1, 96>}, {transform_indices = @transform_3, window_bounds = array<i64: 32, 96>}]} {
    %c0 = arith.constant 0 : index
    %c0_0 = arith.constant 0 : index
    %0 = vector.load %arg1[%c0, %c0_0] : memref<32x48xf32, #tpu.memory_space<vmem>>, vector<32x48xf32>
    %c0_1 = arith.constant 0 : index
    %c0_2 = arith.constant 0 : index
    %1 = vector.load %arg2[%c0_1, %c0_2] : memref<48x96xf32, #tpu.memory_space<vmem>>, vector<48x96xf32>
    %cst = arith.constant dense<0.000000e+00> : vector<32x96xf32>
    %2 = tpu.matmul %0, %1, %cst {dimension_numbers = #tpu.dot_dimension_numbers<[1], [0], [0], [1], [0, 0, 1, 1], [], []>} : vector<32x48xf32>, vector<48x96xf32>, vector<32x96xf32> -> vector<32x96xf32>
    %c0_3 = arith.constant 0 : index
    %c0_4 = arith.constant 0 : index
    %3 = vector.load %arg3[%c0_3, %c0_4] : memref<1x96xf32, #tpu.memory_space<vmem>>, vector<1x96xf32>
    %4 = vector.broadcast %3 : vector<1x96xf32> to vector<32x96xf32>
    %5 = arith.addf %2, %4 : vector<32x96xf32>
    %c0_5 = arith.constant 0 : index
    %c0_6 = arith.constant 0 : index
    %6 = vector.load %arg4[%c0_5, %c0_6] : memref<32x96xf32, #tpu.memory_space<vmem>>, vector<32x96xf32>
    tpu.vector_store %arg4[%c0_5, %c0_6], %5 {strides = array<i32>} : memref<32x96xf32, #tpu.memory_space<vmem>>, vector<32x96xf32>,
    return
  }
  func.func @transform_0(%arg0: i32) -> (i32, i32) {
    %c0_i32 = arith.constant 0 : i32
    %c0_i32_0 = arith.constant 0 : i32
    return %arg0, %c0_i32 : i32, i32
  }
  func.func @transform_1(%arg0: i32) -> (i32, i32) {
    %c0_i32 = arith.constant 0 : i32
    %c0_i32_0 = arith.constant 0 : i32
    %c0_i32_1 = arith.constant 0 : i32
    return %c0_i32, %c0_i32_0 : i32, i32
  }
  func.func @transform_2(%arg0: i32) -> (i32, i32) {
    %c0_i32 = arith.constant 0 : i32
    %c0_i32_0 = arith.constant 0 : i32
    %c0_i32_1 = arith.constant 0 : i32
    return %c0_i32, %c0_i32_0 : i32, i32
  }
  func.func @transform_3(%arg0: i32) -> (i32, i32) {
    %c0_i32 = arith.constant 0 : i32
    %c0_i32_0 = arith.constant 0 : i32
    return %arg0, %c0_i32 : i32, i32
  }
}

</mosaic_0001>

<bundles_post_ra>
// kernel: tpu_custom_call.1
= control target key start
LH: loop header
LB: loop body
LE: loop exit
PB: predicated region body
PF: predicated region fallthrough
CT: control target
= control target key end

     0   :  { %8 = vsyncpa [#allocation3], 0  ;;  %s343_s0 = inlined_call_operand.hbm [shape: f32[32,48], index: 0, kind: input, shape index: {}]   ;;  %s344_s1 = inlined_call_operand.hbm [shape: f32[48,96], index: 1, kind: input, shape index: {}]   ;;  %s345_s2 = inlined_call_operand.vmem [shape: f32[1,96], index: 2, kind: input, shape index: {}]   ;;  %s346_s3 = inlined_call_operand.hbm [shape: f32[32,96], index: 3, kind: output, shape index: {}]  }
   0x1   :  { %9 = vsyncpa [#allocation6], 0 }
   0x2   :  { %10 = vsyncpa [#allocation4], 0  ;;  %s297_s12 = smov [#allocation2]  }
   0x3   :  { %s16_s13 = sshll.u32 %s297_s12, 4  ;;  %s17_s13 = int_to_ptr.vmem [resolvable:$true] %s16_s13 }
   0x4   :  { %s239_s14 = scalar_lea.vmem %s17_s13, 512  ;;  %p244_p1 = scmp.lt.s32.totalorder %s17_s13, %s17_s13 }
   0x5   :  { %p240_p0 = scmp.ne.s32.totalorder %s17_s13, %s239_s14  ;;  %p245_p2 = scmp.lt.s32.totalorder %s239_s14, %s239_s14 }
   0x7   :  { %p246_p3 = por %p245_p2, %p244_p1 }
   0x9   :  { %p247_p4 = pnand %p246_p3, %p240_p0 }
   0xb   :  { %250 = shalt.err (!%p247_p4)
}
   0xc   :  { %s298_s15 = smov 128   ;;  %s299_s16 = smov 8  }
   0xd   :  { %22 = dma.hbm_to_vmem [thread:$0]  %s343_s0, 512, %s17_s13, [#allocation3], %s298_s15, %s298_s15, %s299_s16  }
   0xe   :  { %s300_s19 = smov [#allocation5]  }
   0xf   :  { %s28_s20 = sshll.u32 %s300_s19, 4  ;;  %s29_s20 = int_to_ptr.vmem [resolvable:$true] %s28_s20 }
  0x10   :  { %s259_s21 = scalar_lea.vmem %s29_s20, 768  ;;  %p264_p6 = scmp.lt.s32.totalorder %s29_s20, %s29_s20 }
  0x11   :  { %p260_p5 = scmp.ne.s32.totalorder %s29_s20, %s259_s21  ;;  %p265_p7 = scmp.lt.s32.totalorder %s259_s21, %s259_s21 }
  0x13   :  { %p266_p8 = por %p265_p7, %p264_p6 }
  0x15   :  { %p267_p9 = pnand %p266_p8, %p260_p5 }
  0x17   :  { %270 = shalt.err (!%p267_p9)
}
  0x18   :  { %34 = dma.hbm_to_vmem [thread:$0]  %s344_s1, 768, %s29_s20, [#allocation6], %s298_s15, %s298_s15, %s299_s16  }
  0x19   :  { %291 = dma.done.wait [#allocation3], 512  }
  0x1a   :  { %292 = vsyncadd [#allocation3], 4294966784 }
  0x1b   :  { %293 = dma.done.wait [#allocation6], 768  }
  0x1c   :  { %294 = vsyncadd [#allocation6], 4294966528  ;;  %v52_v0 = vld [vmem:[#allocation5 + $0x28] sm:$0xff]  ;;  %v51_v1 = vld [vmem:[#allocation5 + $0x20] sm:$0xff]  ;;  %vm60_vm0 = vcmask 392192   ;;  %vm158_vm1 = vcmask 785408  }
  0x1d   :  { %196 = vmatprep.subr.mxu0 %v52_v0  ;;  %214 = vmatprep.subr.mxu1 %v52_v0  ;;  %v50_v2 = vld [vmem:[#allocation5 + $0x18] sm:$0xff]  ;;  %v49_v3 = vld [vmem:[#allocation5 + $0x10] sm:$0xff]  ;;  %v48_v4 = vld [vmem:[#allocation5 + $0x8] sm:$0xff]  ;;  %s301_s24 = smov [#allocation7]  }
  0x1e   :  { %197 = vmatpush3.msra.mxu0 %v52_v0  ;;  %220 = vmatpush3.msra.mxu1 %v52_v0  ;;  %v47_v5 = vld [vmem:[#allocation5] sm:$0xff]  ;;  %v45_v7 = vld [vmem:[#allocation2 + $0x10] sm:$0xff]  ;;  %v44_v8 = vld [vmem:[#allocation2 + $0x8] sm:$0xff]  ;;  %s168_s25 = sshll.u32 %s301_s24, 4  ;;  %s169_s25 = int_to_ptr.vmem [resolvable:$true] %s168_s25 }
  0x1f   :  { %198 = vmatprep.subr.mxu0 %v51_v1  ;;  %215 = vmatprep.subr.mxu1 %v51_v1  ;;  %v43_v6 = vld [vmem:[#allocation2] sm:$0xff]  ;;  %v46_v9 = vld [vmem:[#allocation2 + $0x18] sm:$0xff]  ;;  %s271_s26 = scalar_lea.vmem %s169_s25, 512  ;;  %p276_p11 = scmp.lt.s32.totalorder %s169_s25, %s169_s25 }
  0x20   :  { %199 = vmatpush3.msra.mxu0 %v51_v1  ;;  %221 = vmatpush3.msra.mxu1 %v51_v1  ;;  %v181_v10 = vld [vmem:[%s345_s2] ss:$0 sm:$0xff]  ;;  %p272_p10 = scmp.ne.s32.totalorder %s169_s25, %s271_s26  ;;  %p277_p12 = scmp.lt.s32.totalorder %s271_s26, %s271_s26 }
  0x21   :  { %200 = vmatprep.subr.mxu0 %v50_v2  ;;  %216 = vmatprep.subr.mxu1 %v50_v2 }
  0x22   :  { %201 = vmatpush3.msra.mxu0 %v50_v2  ;;  %222 = vmatpush3.msra.mxu1 %v50_v2  ;;  %p278_p13 = por %p277_p12, %p276_p11 }
  0x23   :  { %202 = vmatprep.subr.mxu0 %v49_v3  ;;  %217 = vmatprep.subr.mxu1 %v49_v3 }
  0x24   :  { %203 = vmatpush3.msra.mxu0 %v49_v3  ;;  %223 = vmatpush3.msra.mxu1 %v49_v3  ;;  %p279_p0 = pnand %p278_p13, %p272_p10 }
  0x25   :  { %204 = vmatprep.subr.mxu0 %v48_v4  ;;  %218 = vmatprep.subr.mxu1 %v48_v4 }
  0x26   :  { %205 = vmatpush3.msra.mxu0 %v48_v4  ;;  %224 = vmatpush3.msra.mxu1 %v48_v4 }
  0x27   :  { %206 = vmatprep.subr.mxu0 %v47_v5  ;;  %219 = vmatprep.subr.mxu1 %v47_v5 }
  0x28   :  { %207 = vmatpush3.msra.mxu0 %v47_v5  ;;  %225 = vmatpush3.msra.mxu1 %v47_v5 }
  0x29   :  { %208 = vmatprep.mubr.msk.f32.mxu0 %vm60_vm0, %v43_v6  ;;  %211 = vmatprep.mubr.msk.f32.mxu1 %vm60_vm0, %v45_v7 }
  0x2a   :  { %209 = vmatmul.mubr.msk.f32.vlgmr.msra.gmra.mxu0 %vm60_vm0, %v44_v8  ;;  %212 = vmatmul.mubr.msk.f32.vlgmr.msra.gmra.mxu1 %vm60_vm0, %v46_v9 }
  0xea   :  { %v210_v11 = vpop.f32.mrf.mxu0  ;;  %v213_v12 = vpop.f32.mrf.mxu1 }
  0xeb   :  { %v145_v13 = vadd.f32 %v210_v11, %v181_v10  ;;  %v155_v14 = vadd.f32 %v213_v12, %v181_v10 }
  0xec   :  { %v139_v15 = vpop.f32.mrf.mxu0  ;;  %v149_v16 = vpop.f32.mrf.mxu1 }
  0xed   :  { %160 = vst.msk [vmem:[#allocation7 + $0x8] sm:$0xff] %vm158_vm1, %v145_v13  ;;  %162 = vst.msk [vmem:[#allocation7 + $0x18] sm:$0xff] %vm158_vm1, %v155_v14  ;;  %v140_v17 = vadd.f32 %v181_v10, %v139_v15  ;;  %v150_v18 = vadd.f32 %v181_v10, %v149_v16 }
  0xef   :  { %159 = vst.msk [vmem:[#allocation7] sm:$0xff] %vm158_vm1, %v140_v17  ;;  %161 = vst.msk [vmem:[#allocation7 + $0x10] sm:$0xff] %vm158_vm1, %v150_v18 }
  0xf0   :  { %282 = shalt.err (!%p279_p0)
}
  0xf1   :  { %174 = dma.vmem_to_hbm [thread:$0]  %s169_s25, 512, %s346_s3, [#allocation4], %s298_s15, %s298_s15, %s299_s16  }
  0xf2   :  { %295 = dma.done.wait [#allocation4], 512  }
  0xf3   :  { %296 = vsyncadd [#allocation4], 4294966784 }
  0xf4   :  { %178 = vsyncpa [#allocation3], 1 }
  0xf5   :  { %179 = vsyncpa [#allocation6], 1 }
  0xf6   :  { %180 = vsyncpa [#allocation4], 1 }

</bundles_post_ra>
